<compile_context>
chip_gen: v7x
topology: tpu7x:2x2x1
jax: 0.10.0
libtpu: 0.0.40
codegen_flags: <defaults>
</compile_context>

<pallas_src>
import jax
import jax.numpy as jnp
import numpy as np
from jax.experimental import pallas as pl
from jax.experimental.pallas import tpu as pltpu

EPS = 1e-5
LANE = 128


def _vmem_limit_bytes():
    try:
        cap = int(pltpu.get_tpu_info().vmem_capacity_bytes)
    except Exception:
        cap = 64 * 1024 * 1024          # conservative (v7x physical VMEM)
    return int(min((cap * 3) // 4, 112 * 1024 * 1024))


def _choose_batch_tile(B, L, Cp, vmem_limit_bytes):
    """Pick TB (batch elements per grid step): fit ~half the VMEM limit,
    target ~1k matmul rows per step, cap unrolled code size, divide B."""
    per_b = 48 * L * Cp                          # rough live bytes / batch elem
    tb_vmem = max(1, (vmem_limit_bytes // 2) // per_b)
    tb_rows = max(1, 1024 // L)
    tb = int(max(1, min(tb_vmem, tb_rows, 8, B)))
    while B % tb:
        tb -= 1
    return tb


def _make_conv_layer_kernel(tb: int, seq_len: int, n_total: int, l_out: int):
    """tb: batch elems per block; n_total: B*L (BN count); l_out: pooled len."""

    def kernel(x_ref, w_ref, g_ref, beta_ref, o_ref,
               sum_ref, sumsq_ref, pivot_ref, z_ref):
        ph = pl.program_id(0)   # 0: accumulate BN stats; 1: normalize/ELU/pool
        b = pl.program_id(1)    # batch-block index

        L = seq_len
        Cp = x_ref.shape[2]

        # ---- Conv1d(k=3, circular padding=1): one fused MXU matmul ---------
        # Per-slab circular shifts (f32 rolls; proven lowering), slabs stacked
        # into a single (tb*L, 3*Cp) LHS so the MXU sees one big matmul.
        slabs = []
        for t in range(tb):
            xt = x_ref[t].astype(jnp.float32)             # (L, Cp)
            xm1 = pltpu.roll(xt, shift=1, axis=0)         # x[(l-1) mod L]
            xp1 = pltpu.roll(xt, shift=L - 1, axis=0)     # x[(l+1) mod L]
            slabs.append(jnp.concatenate([xm1, xt, xp1], axis=1))   # (L, 3Cp)
        a = slabs[0] if tb == 1 else jnp.concatenate(slabs, axis=0)  # (tb*L,3Cp)
        y = jnp.dot(a.astype(jnp.bfloat16), w_ref[...],
                    preferred_element_type=jnp.float32)    # (tb*L, Cp) f32
        # conv bias intentionally dropped: exactly cancelled by the
        # training-mode BatchNorm mean subtraction below.

        @pl.when(jnp.logical_and(ph == 0, b == 0))
        def _init():
            sum_ref[...] = jnp.zeros_like(sum_ref)
            sumsq_ref[...] = jnp.zeros_like(sumsq_ref)
            # per-channel pivot for a well-conditioned single-pass variance
            pivot_ref[...] = y[0:1, :]

        @pl.when(ph == 0)
        def _accumulate():
            d = y - pivot_ref[...]
            sum_ref[...] += jnp.sum(d, axis=0, keepdims=True)
            sumsq_ref[...] += jnp.sum(d * d, axis=0, keepdims=True)

        @pl.when(ph == 1)
        def _finalize():
            # BatchNorm1d, training-mode batch stats (biased variance) from
            # pivot-shifted sum / sum-of-squares.
            # TODO(synk): running_mean / running_var buffer updates (a
            # training-time side effect of nn.BatchNorm1d) are not produced.
            inv_n = jnp.float32(1.0 / n_total)
            dmean = sum_ref[...] * inv_n                          # (1, Cp)
            mean = pivot_ref[...] + dmean
            var = jnp.maximum(sumsq_ref[...] * inv_n - dmean * dmean, 0.0)
            scale = jax.lax.rsqrt(var + EPS) * g_ref[...]         # (1, Cp)
            yn = (y - mean) * scale + beta_ref[...]               # (tb*L, Cp)

            # ELU(alpha=1).  TODO(synk): expm1 would be marginally closer to
            # the PyTorch reference near zero.
            z = jnp.where(yn > 0, yn, jnp.exp(jnp.minimum(yn, 0.0)) - 1.0)

            # MaxPool1d(kernel=3, stride=2, padding=1):
            #   out[j] = max(z[2j-1], z[2j], z[2j+1]),  z[-1] -> -inf
            # Even/odd decimation via sublane-strided reads of a VMEM scratch,
            # per batch slab, each ending in a dense lane-aligned store.
            z_ref[...] = z
            j_idx = jax.lax.broadcasted_iota(jnp.int32, (l_out, Cp), 0)
            row0 = j_idx == 0
            for t in range(tb):
                z_even = z_ref[pl.ds(t * L, l_out, stride=2), :]       # z[2j]
                z_odd = z_ref[pl.ds(t * L + 1, l_out, stride=2), :]    # z[2j+1]
                left = pltpu.roll(z_odd, shift=1, axis=0)              # z[2j-1]
                # ELU output >= -1, so -1e30 acts as the pool's -inf padding.
                left = jnp.where(row0, jnp.float32(-1e30), left)
                pooled = jnp.maximum(jnp.maximum(z_even, z_odd), left)
                o_ref[t] = pooled.astype(o_ref.dtype)

    return kernel


def conv_layer_forward(x, conv_w, conv_b, bn_gamma, bn_beta):
    """ConvLayer forward.  x: (B, L, C) float32;  conv_w: (C_out, C_in, 3)."""
    del conv_b  # exactly cancelled by training-mode BatchNorm mean subtraction
    B, L, C = x.shape
    assert L % 2 == 0, "even sequence length assumed by the stride-2 pooling"
    L_out = (L + 2 - 3) // 2 + 1            # == L // 2 for even L
    Cp = ((C + LANE - 1) // LANE) * LANE    # lane-dense channel padding

    vmem_limit = _vmem_limit_bytes()
    TB = _choose_batch_tile(B, L, Cp, vmem_limit)
    nb = B // TB

    # bf16 channel pad in one fused XLA pass; padded channels are inert
    # through conv/BN/ELU/pool and sliced off afterwards.
    xp = jnp.pad(jnp.asarray(x).astype(jnp.bfloat16),
                 ((0, 0), (0, 0), (0, Cp - C)))

    # fuse the 3 conv taps into one (3*Cp, Cp) bf16 weight so the kernel does
    # a single MXU matmul of [x_{l-1} | x_l | x_{l+1}] @ Wcat per block.
    w_np = np.zeros((3 * Cp, Cp), np.float32)
    cw = np.asarray(conv_w, np.float32)
    for k in range(3):
        w_np[k * Cp:k * Cp + C, :C] = cw[:, :, k].T              # (in, out)
    wcat = jnp.asarray(w_np, jnp.bfloat16)

    g_np = np.zeros((1, Cp), np.float32)
    g_np[0, :C] = np.asarray(bn_gamma, np.float32)
    b_np = np.zeros((1, Cp), np.float32)
    b_np[0, :C] = np.asarray(bn_beta, np.float32)
    gamma = jnp.asarray(g_np)
    beta = jnp.asarray(b_np)

    kernel = _make_conv_layer_kernel(TB, L, B * L, L_out)

    out = pl.pallas_call(
        kernel,
        out_shape=jax.ShapeDtypeStruct((B, L_out, Cp), jnp.float32),
        grid_spec=pltpu.PrefetchScalarGridSpec(
            num_scalar_prefetch=0,
            # axis 0 = phase (0: BN-stat accumulation, 1: normalize+pool),
            # axis 1 = batch block.  Phase 0 must finish over all batch blocks
            # before phase 1 starts, so both axes are sequential.
            grid=(2, nb),
            in_specs=[
                pl.BlockSpec((TB, L, Cp), lambda ph, b: (b, 0, 0)),
                pl.BlockSpec((3 * Cp, Cp), lambda ph, b: (0, 0)),
                pl.BlockSpec((1, Cp), lambda ph, b: (0, 0)),
                pl.BlockSpec((1, Cp), lambda ph, b: (0, 0)),
            ],
            # `ph * b` keeps output block 0 resident through phase 0 (never
            # written back before it holds real data), then walks the batch
            # blocks monotonically during phase 1.
            out_specs=pl.BlockSpec((TB, L_out, Cp), lambda ph, b: (ph * b, 0, 0)),
            scratch_shapes=[
                pltpu.VMEM((1, Cp), jnp.float32),      # per-channel sum(d)
                pltpu.VMEM((1, Cp), jnp.float32),      # per-channel sum(d^2)
                pltpu.VMEM((1, Cp), jnp.float32),      # per-channel pivot
                pltpu.VMEM((TB * L, Cp), jnp.float32), # ELU output (pool staging)
            ],
        ),
        compiler_params=pltpu.CompilerParams(
            # TODO(synk): on v7x (2 TensorCores) the single-scratch BN
            # accumulation keeps both grid axes sequential; per-core partial
            # stats (core_map barrier or two pallas_calls) would buy up to 2x.
            dimension_semantics=("arbitrary", "arbitrary"),
            vmem_limit_bytes=vmem_limit,
        ),
    )(xp, wcat, gamma, beta)

    return out[:, :, :C].astype(x.dtype)


def ref_forward_np(x, W, b, gamma, beta):
    """Pure NumPy reference mirroring the PyTorch forward (float64)."""
    x = np.asarray(x, np.float64)
    W = np.asarray(W, np.float64)
    b = np.asarray(b, np.float64)
    gamma = np.asarray(gamma, np.float64)
    beta = np.asarray(beta, np.float64)

    B, L, C = x.shape
    xc = np.transpose(x, (0, 2, 1))                          # (B, C, L)
    xpad = np.concatenate([xc[:, :, -1:], xc, xc[:, :, :1]], axis=-1)  # circular
    y = np.zeros((B, C, L), np.float64)
    for k in range(3):
        y += np.einsum('oi,nil->nol', W[:, :, k], xpad[:, :, k:k + L])
    y += b[None, :, None]

    mean = y.mean(axis=(0, 2), keepdims=True)
    var = ((y - mean) ** 2).mean(axis=(0, 2), keepdims=True)
    yn = (y - mean) / np.sqrt(var + EPS) * gamma[None, :, None] + beta[None, :, None]

    z = np.where(yn > 0, yn, np.expm1(np.minimum(yn, 0.0)))

    L_out = (L + 2 - 3) // 2 + 1
    pad = np.full((B, C, 1), -np.inf)
    zpad = np.concatenate([pad, z, pad], axis=-1)
    pooled = np.stack([zpad[:, :, 2 * j:2 * j + 3].max(axis=-1)
                       for j in range(L_out)], axis=-1)       # (B, C, L_out)
    return np.transpose(pooled, (0, 2, 1))                    # (B, L_out, C)


if __name__ == "__main__":
    B, L, C = 2, 16, 32            # batch, seq_len, c_in

    key = jax.random.PRNGKey(0)
    kx, kw, kb, kg, kbe = jax.random.split(key, 5)

    x = jax.random.normal(kx, (B, L, C), dtype=jnp.float32)

    fan_in = C * 3
    bound = 1.0 / np.sqrt(fan_in)
    conv_w = jax.random.uniform(kw, (C, C, 3), jnp.float32, -bound, bound)
    conv_b = jax.random.uniform(kb, (C,), jnp.float32, -bound, bound)
    bn_gamma = 1.0 + 0.1 * jax.random.normal(kg, (C,), dtype=jnp.float32)
    bn_beta = 0.1 * jax.random.normal(kbe, (C,), dtype=jnp.float32)

    out = conv_layer_forward(x, conv_w, conv_b, bn_gamma, bn_beta)
    out = jax.block_until_ready(out)

    L_out = (L + 2 - 3) // 2 + 1
    assert out.shape == (B, L_out, C), out.shape

    ref = ref_forward_np(x, conv_w, conv_b, bn_gamma, bn_beta)
    np.testing.assert_allclose(np.asarray(out, np.float64), ref,
                               rtol=2e-2, atol=2e-2)
    print("KERNEL_OK")
</pallas_src>

<mosaic_0001>
module attributes {stable_mosaic.version = 11 : i64} {
  func.func @kernel(%arg0: i32, %arg1: i32, %arg2: memref<2x16x128xbf16, #tpu.memory_space<vmem>>, %arg3: memref<384x128xbf16, #tpu.memory_space<vmem>>, %arg4: memref<1x128xf32, #tpu.memory_space<vmem>>, %arg5: memref<1x128xf32, #tpu.memory_space<vmem>>, %arg6: memref<2x8x128xf32, #tpu.memory_space<vmem>>, %arg7: memref<1x128xf32, #tpu.memory_space<vmem>>, %arg8: memref<1x128xf32, #tpu.memory_space<vmem>>, %arg9: memref<1x128xf32, #tpu.memory_space<vmem>>, %arg10: memref<32x128xf32, #tpu.memory_space<vmem>>) attributes {dimension_semantics = [#tpu.dimension_semantics<arbitrary>, #tpu.dimension_semantics<arbitrary>], iteration_bounds = array<i64: 2, 1>, scalar_prefetch = 0 : i64, scratch_operands = 4 : i64, tpu.core_type = #tpu.core_type<tc>, window_params = [{transform_indices = @transform_0, window_bounds = array<i64: 2, 16, 128>}, {pipeline_mode = #tpu.pipeline_mode<synchronous>, transform_indices = @transform_1, window_bounds = array<i64: 384, 128>}, {pipeline_mode = #tpu.pipeline_mode<synchronous>, transform_indices = @transform_2, window_bounds = array<i64: 1, 128>}, {pipeline_mode = #tpu.pipeline_mode<synchronous>, transform_indices = @transform_3, window_bounds = array<i64: 1, 128>}, {transform_indices = @transform_4, window_bounds = array<i64: 2, 8, 128>}]} {
    %c0 = arith.constant 0 : index
    %c0_0 = arith.constant 0 : index
    %c0_1 = arith.constant 0 : index
    %0 = vector.load %arg2[%c0, %c0_0, %c0_1] : memref<2x16x128xbf16, #tpu.memory_space<vmem>>, vector<1x16x128xbf16>
    %1 = vector.shape_cast %0 : vector<1x16x128xbf16> to vector<16x128xbf16>
    %2 = arith.extf %1 : vector<16x128xbf16> to vector<16x128xf32>
    %c1_i32 = arith.constant 1 : i32
    %3 = tpu.dynamic_rotate %2 by %c1_i32 dim 0 : vector<16x128xf32>, i32 -> vector<16x128xf32>
    %c15_i32 = arith.constant 15 : i32
    %4 = tpu.dynamic_rotate %2 by %c15_i32 dim 0 : vector<16x128xf32>, i32 -> vector<16x128xf32>
    %5 = tpu.concatenate %3, %2, %4 in 1 : vector<16x128xf32>, vector<16x128xf32>, vector<16x128xf32> -> vector<16x384xf32>
    %c1 = arith.constant 1 : index
    %c0_2 = arith.constant 0 : index
    %c0_3 = arith.constant 0 : index
    %6 = vector.load %arg2[%c1, %c0_2, %c0_3] : memref<2x16x128xbf16, #tpu.memory_space<vmem>>, vector<1x16x128xbf16>
    %7 = vector.shape_cast %6 : vector<1x16x128xbf16> to vector<16x128xbf16>
    %8 = arith.extf %7 : vector<16x128xbf16> to vector<16x128xf32>
    %c1_i32_4 = arith.constant 1 : i32
    %9 = tpu.dynamic_rotate %8 by %c1_i32_4 dim 0 : vector<16x128xf32>, i32 -> vector<16x128xf32>
    %c15_i32_5 = arith.constant 15 : i32
    %10 = tpu.dynamic_rotate %8 by %c15_i32_5 dim 0 : vector<16x128xf32>, i32 -> vector<16x128xf32>
    %11 = tpu.concatenate %9, %8, %10 in 1 : vector<16x128xf32>, vector<16x128xf32>, vector<16x128xf32> -> vector<16x384xf32>
    %12 = tpu.concatenate %5, %11 in 0 : vector<16x384xf32>, vector<16x384xf32> -> vector<32x384xf32>
    %13 = arith.truncf %12 : vector<32x384xf32> to vector<32x384xbf16>
    %c0_6 = arith.constant 0 : index
    %c0_7 = arith.constant 0 : index
    %14 = vector.load %arg3[%c0_6, %c0_7] : memref<384x128xbf16, #tpu.memory_space<vmem>>, vector<384x128xbf16>
    %cst = arith.constant dense<0.000000e+00> : vector<32x128xf32>
    %15 = tpu.matmul %13, %14, %cst {dimension_numbers = #tpu.dot_dimension_numbers<[1], [0], [0], [1], [0, 0, 1, 1], [], []>} : vector<32x384xbf16>, vector<384x128xbf16>, vector<32x128xf32> -> vector<32x128xf32>
    %c0_i32 = arith.constant 0 : i32
    %16 = arith.cmpi eq, %arg0, %c0_i32 : i32
    %c0_i32_8 = arith.constant 0 : i32
    %17 = arith.cmpi eq, %arg1, %c0_i32_8 : i32
    %18 = arith.andi %16, %17 : i1
    %19 = arith.extui %18 : i1 to i32
    %c0_i32_9 = arith.constant 0 : i32
    %20 = arith.cmpi ne, %19, %c0_i32_9 : i32
    scf.if %20 {
      %cst_14 = arith.constant 0.000000e+00 : f32
      %27 = vector.broadcast %cst_14 : f32 to vector<1x128xf32>
      %c0_15 = arith.constant 0 : index
      %c0_16 = arith.constant 0 : index
      %28 = vector.load %arg7[%c0_15, %c0_16] : memref<1x128xf32, #tpu.memory_space<vmem>>, vector<1x128xf32>
      tpu.vector_store %arg7[%c0_15, %c0_16], %27 {strides = array<i32>} : memref<1x128xf32, #tpu.memory_space<vmem>>, vector<1x128xf32>,
      %cst_17 = arith.constant 0.000000e+00 : f32
      %29 = vector.broadcast %cst_17 : f32 to vector<1x128xf32>
      %c0_18 = arith.constant 0 : index
      %c0_19 = arith.constant 0 : index
      %30 = vector.load %arg8[%c0_18, %c0_19] : memref<1x128xf32, #tpu.memory_space<vmem>>, vector<1x128xf32>
      tpu.vector_store %arg8[%c0_18, %c0_19], %29 {strides = array<i32>} : memref<1x128xf32, #tpu.memory_space<vmem>>, vector<1x128xf32>,
      %31 = vector.extract_strided_slice %15 {offsets = [0, 0], sizes = [1, 128], strides = [1, 1]} : vector<32x128xf32> to vector<1x128xf32>
      %c0_20 = arith.constant 0 : index
      %c0_21 = arith.constant 0 : index
      %32 = vector.load %arg9[%c0_20, %c0_21] : memref<1x128xf32, #tpu.memory_space<vmem>>, vector<1x128xf32>
      tpu.vector_store %arg9[%c0_20, %c0_21], %31 {strides = array<i32>} : memref<1x128xf32, #tpu.memory_space<vmem>>, vector<1x128xf32>,
    } else {
    }
    %c0_i32_10 = arith.constant 0 : i32
    %21 = arith.cmpi eq, %arg0, %c0_i32_10 : i32
    %22 = arith.extui %21 : i1 to i32
    %c0_i32_11 = arith.constant 0 : i32
    %23 = arith.cmpi ne, %22, %c0_i32_11 : i32
    scf.if %23 {
      %c0_14 = arith.constant 0 : index
      %c0_15 = arith.constant 0 : index
      %27 = vector.load %arg9[%c0_14, %c0_15] : memref<1x128xf32, #tpu.memory_space<vmem>>, vector<1x128xf32>
      %28 = vector.broadcast %27 : vector<1x128xf32> to vector<32x128xf32>
      %29 = arith.subf %15, %28 : vector<32x128xf32>
      %c0_16 = arith.constant 0 : index
      %c0_17 = arith.constant 0 : index
      %30 = vector.load %arg7[%c0_16, %c0_17] : memref<1x128xf32, #tpu.memory_space<vmem>>, vector<1x128xf32>
      %cst_18 = arith.constant dense<0.000000e+00> : vector<128xf32>
      %31 = vector.multi_reduction <add>, %29, %cst_18 [0] : vector<32x128xf32> to vector<128xf32>
      %32 = vector.shape_cast %31 : vector<128xf32> to vector<1x128xf32>
      %33 = arith.addf %30, %32 : vector<1x128xf32>
      %c0_19 = arith.constant 0 : index
      %c0_20 = arith.constant 0 : index
      %34 = vector.load %arg7[%c0_19, %c0_20] : memref<1x128xf32, #tpu.memory_space<vmem>>, vector<1x128xf32>
      tpu.vector_store %arg7[%c0_19, %c0_20], %33 {strides = array<i32>} : memref<1x128xf32, #tpu.memory_space<vmem>>, vector<1x128xf32>,
      %c0_21 = arith.constant 0 : index
      %c0_22 = arith.constant 0 : index
      %35 = vector.load %arg8[%c0_21, %c0_22] : memref<1x128xf32, #tpu.memory_space<vmem>>, vector<1x128xf32>
      %36 = arith.mulf %29, %29 : vector<32x128xf32>
      %cst_23 = arith.constant dense<0.000000e+00> : vector<128xf32>
      %37 = vector.multi_reduction <add>, %36, %cst_23 [0] : vector<32x128xf32> to vector<128xf32>
      %38 = vector.shape_cast %37 : vector<128xf32> to vector<1x128xf32>
      %39 = arith.addf %35, %38 : vector<1x128xf32>
      %c0_24 = arith.constant 0 : index
      %c0_25 = arith.constant 0 : index
      %40 = vector.load %arg8[%c0_24, %c0_25] : memref<1x128xf32, #tpu.memory_space<vmem>>, vector<1x128xf32>
      tpu.vector_store %arg8[%c0_24, %c0_25], %39 {strides = array<i32>} : memref<1x128xf32, #tpu.memory_space<vmem>>, vector<1x128xf32>,
    } else {
    }
    %c1_i32_12 = arith.constant 1 : i32
    %24 = arith.cmpi eq, %arg0, %c1_i32_12 : i32
    %25 = arith.extui %24 : i1 to i32
    %c0_i32_13 = arith.constant 0 : i32
    %26 = arith.cmpi ne, %25, %c0_i32_13 : i32
    scf.if %26 {
      %c0_14 = arith.constant 0 : index
      %c0_15 = arith.constant 0 : index
      %27 = vector.load %arg7[%c0_14, %c0_15] : memref<1x128xf32, #tpu.memory_space<vmem>>, vector<1x128xf32>
      %cst_16 = arith.constant 3.125000e-02 : f32
      %28 = vector.broadcast %cst_16 : f32 to vector<1x128xf32>
      %29 = arith.mulf %27, %28 : vector<1x128xf32>
      %c0_17 = arith.constant 0 : index
      %c0_18 = arith.constant 0 : index
      %30 = vector.load %arg9[%c0_17, %c0_18] : memref<1x128xf32, #tpu.memory_space<vmem>>, vector<1x128xf32>
      %31 = arith.addf %30, %29 : vector<1x128xf32>
      %c0_19 = arith.constant 0 : index
      %c0_20 = arith.constant 0 : index
      %32 = vector.load %arg8[%c0_19, %c0_20] : memref<1x128xf32, #tpu.memory_space<vmem>>, vector<1x128xf32>
      %cst_21 = arith.constant 3.125000e-02 : f32
      %33 = vector.broadcast %cst_21 : f32 to vector<1x128xf32>
      %34 = arith.mulf %32, %33 : vector<1x128xf32>
      %35 = arith.mulf %29, %29 : vector<1x128xf32>
      %36 = arith.subf %34, %35 : vector<1x128xf32>
      %cst_22 = arith.constant 0.000000e+00 : f32
      %37 = vector.broadcast %cst_22 : f32 to vector<1x128xf32>
      %38 = arith.maximumf %36, %37 : vector<1x128xf32>
      %cst_23 = arith.constant 9.99999974E-6 : f32
      %39 = vector.broadcast %cst_23 : f32 to vector<1x128xf32>
      %40 = arith.addf %38, %39 : vector<1x128xf32>
      %41 = math.rsqrt %40 : vector<1x128xf32>
      %c0_24 = arith.constant 0 : index
      %c0_25 = arith.constant 0 : index
      %42 = vector.load %arg4[%c0_24, %c0_25] : memref<1x128xf32, #tpu.memory_space<vmem>>, vector<1x128xf32>
      %43 = arith.mulf %41, %42 : vector<1x128xf32>
      %44 = vector.broadcast %31 : vector<1x128xf32> to vector<32x128xf32>
      %45 = arith.subf %15, %44 : vector<32x128xf32>
      %46 = vector.broadcast %43 : vector<1x128xf32> to vector<32x128xf32>
      %47 = arith.mulf %45, %46 : vector<32x128xf32>
      %c0_26 = arith.constant 0 : index
      %c0_27 = arith.constant 0 : index
      %48 = vector.load %arg5[%c0_26, %c0_27] : memref<1x128xf32, #tpu.memory_space<vmem>>, vector<1x128xf32>
      %49 = vector.broadcast %48 : vector<1x128xf32> to vector<32x128xf32>
      %50 = arith.addf %47, %49 : vector<32x128xf32>
      %cst_28 = arith.constant 0.000000e+00 : f32
      %51 = vector.broadcast %cst_28 : f32 to vector<32x128xf32>
      %52 = arith.cmpf ogt, %50, %51 : vector<32x128xf32>
      %cst_29 = arith.constant 0.000000e+00 : f32
      %53 = vector.broadcast %cst_29 : f32 to vector<32x128xf32>
      %54 = arith.minimumf %50, %53 : vector<32x128xf32>
      %55 = math.exp %54 : vector<32x128xf32>
      %cst_30 = arith.constant 1.000000e+00 : f32
      %56 = vector.broadcast %cst_30 : f32 to vector<32x128xf32>
      %57 = arith.subf %55, %56 : vector<32x128xf32>
      %58 = arith.select %52, %50, %57 : vector<32x128xi1>, vector<32x128xf32>
      %c0_31 = arith.constant 0 : index
      %c0_32 = arith.constant 0 : index
      %59 = vector.load %arg10[%c0_31, %c0_32] : memref<32x128xf32, #tpu.memory_space<vmem>>, vector<32x128xf32>
      tpu.vector_store %arg10[%c0_31, %c0_32], %58 {strides = array<i32>} : memref<32x128xf32, #tpu.memory_space<vmem>>, vector<32x128xf32>,
      %60 = tpu.iota {dimensions = array<i32: 0>} : vector<8x128xi32>
      %c0_i32_33 = arith.constant 0 : i32
      %61 = vector.broadcast %c0_i32_33 : i32 to vector<8x128xi32>
      %62 = arith.cmpi eq, %60, %61 : vector<8x128xi32>
      %c0_34 = arith.constant 0 : index
      %c0_35 = arith.constant 0 : index
      %63 = tpu.strided_load %arg10[%c0_34, %c0_35] {strides = array<i32: 2, 1>} : memref<32x128xf32, #tpu.memory_space<vmem>>, vector<8x128xf32>
      %c1_36 = arith.constant 1 : index
      %c0_37 = arith.constant 0 : index
      %64 = tpu.strided_load %arg10[%c1_36, %c0_37] {strides = array<i32: 2, 1>} : memref<32x128xf32, #tpu.memory_space<vmem>>, vector<8x128xf32>
      %c1_i32_38 = arith.constant 1 : i32
      %65 = tpu.dynamic_rotate %64 by %c1_i32_38 dim 0 : vector<8x128xf32>, i32 -> vector<8x128xf32>
      %cst_39 = arith.constant -1.000000e+30 : f32
      %66 = vector.broadcast %cst_39 : f32 to vector<8x128xf32>
      %67 = arith.select %62, %66, %65 : vector<8x128xi1>, vector<8x128xf32>
      %68 = arith.maximumf %63, %64 : vector<8x128xf32>
      %69 = arith.maximumf %68, %67 : vector<8x128xf32>
      %c0_40 = arith.constant 0 : index
      %c0_41 = arith.constant 0 : index
      %c0_42 = arith.constant 0 : index
      %70 = vector.load %arg6[%c0_40, %c0_41, %c0_42] : memref<2x8x128xf32, #tpu.memory_space<vmem>>, vector<1x8x128xf32>
      %71 = vector.shape_cast %70 : vector<1x8x128xf32> to vector<8x128xf32>
      %72 = vector.shape_cast %69 : vector<8x128xf32> to vector<1x8x128xf32>
      tpu.vector_store %arg6[%c0_40, %c0_41, %c0_42], %72 {strides = array<i32>} : memref<2x8x128xf32, #tpu.memory_space<vmem>>, vector<1x8x128xf32>,
      %c16 = arith.constant 16 : index
      %c0_43 = arith.constant 0 : index
      %73 = tpu.strided_load %arg10[%c16, %c0_43] {strides = array<i32: 2, 1>} : memref<32x128xf32, #tpu.memory_space<vmem>>, vector<8x128xf32>
      %c17 = arith.constant 17 : index
      %c0_44 = arith.constant 0 : index
      %74 = tpu.strided_load %arg10[%c17, %c0_44] {strides = array<i32: 2, 1>} : memref<32x128xf32, #tpu.memory_space<vmem>>, vector<8x128xf32>
      %c1_i32_45 = arith.constant 1 : i32
      %75 = tpu.dynamic_rotate %74 by %c1_i32_45 dim 0 : vector<8x128xf32>, i32 -> vector<8x128xf32>
      %cst_46 = arith.constant -1.000000e+30 : f32
      %76 = vector.broadcast %cst_46 : f32 to vector<8x128xf32>
      %77 = arith.select %62, %76, %75 : vector<8x128xi1>, vector<8x128xf32>
      %78 = arith.maximumf %73, %74 : vector<8x128xf32>
      %79 = arith.maximumf %78, %77 : vector<8x128xf32>
      %c1_47 = arith.constant 1 : index
      %c0_48 = arith.constant 0 : index
      %c0_49 = arith.constant 0 : index
      %80 = vector.load %arg6[%c1_47, %c0_48, %c0_49] : memref<2x8x128xf32, #tpu.memory_space<vmem>>, vector<1x8x128xf32>
      %81 = vector.shape_cast %80 : vector<1x8x128xf32> to vector<8x128xf32>
      %82 = vector.shape_cast %79 : vector<8x128xf32> to vector<1x8x128xf32>
      tpu.vector_store %arg6[%c1_47, %c0_48, %c0_49], %82 {strides = array<i32>} : memref<2x8x128xf32, #tpu.memory_space<vmem>>, vector<1x8x128xf32>,
    } else {
    }
    return
  }
  func.func @transform_0(%arg0: i32, %arg1: i32) -> (i32, i32, i32) {
    %c0_i32 = arith.constant 0 : i32
    %c0_i32_0 = arith.constant 0 : i32
    %c0_i32_1 = arith.constant 0 : i32
    return %arg1, %c0_i32, %c0_i32_0 : i32, i32, i32
  }
  func.func @transform_1(%arg0: i32, %arg1: i32) -> (i32, i32) {
    %c0_i32 = arith.constant 0 : i32
    %c0_i32_0 = arith.constant 0 : i32
    %c0_i32_1 = arith.constant 0 : i32
    return %c0_i32, %c0_i32_0 : i32, i32
  }
  func.func @transform_2(%arg0: i32, %arg1: i32) -> (i32, i32) {
    %c0_i32 = arith.constant 0 : i32
    %c0_i32_0 = arith.constant 0 : i32
    %c0_i32_1 = arith.constant 0 : i32
    return %c0_i32, %c0_i32_0 : i32, i32
  }
  func.func @transform_3(%arg0: i32, %arg1: i32) -> (i32, i32) {
    %c0_i32 = arith.constant 0 : i32
    %c0_i32_0 = arith.constant 0 : i32
    %c0_i32_1 = arith.constant 0 : i32
    return %c0_i32, %c0_i32_0 : i32, i32
  }
  func.func @transform_4(%arg0: i32, %arg1: i32) -> (i32, i32, i32) {
    %0 = arith.muli %arg0, %arg1 : i32
    %c0_i32 = arith.constant 0 : i32
    %c0_i32_0 = arith.constant 0 : i32
    %c0_i32_1 = arith.constant 0 : i32
    return %0, %c0_i32, %c0_i32_0 : i32, i32, i32
  }
}

</mosaic_0001>

<bundles_post_ra>
// kernel: tpu_custom_call.1
= control target key start
LH: loop header
LB: loop body
LE: loop exit
PB: predicated region body
PF: predicated region fallthrough
CT: control target
= control target key end

     0   :  { %9 = vsyncpa [#allocation7], 0  ;;  %s1344_s0 = inlined_call_operand.hbm [shape: bf16[2,16,128], index: 0, kind: input, shape index: {}]   ;;  %s1345_s1 = inlined_call_operand.hbm [shape: bf16[384,128], index: 1, kind: input, shape index: {}]   ;;  %s1346_s2 = inlined_call_operand.vmem [shape: f32[1,128], index: 2, kind: input, shape index: {}]   ;;  %s1347_s3 = inlined_call_operand.vmem [shape: f32[1,128], index: 3, kind: input, shape index: {}]   ;;  %s1348_s4 = inlined_call_operand.hbm [shape: f32[2,8,128], index: 4, kind: output, shape index: {}]  }
   0x1   :  { %10 = vsyncpa [#allocation10], 0 }
   0x2   :  { %11 = vsyncpa [#allocation8], 0 }
   0x3   :  { %13 = vsyncpa [#allocation8 + $0x1], 0  ;;  %s1159_s15 = smov 0   ;;  %s1161_s16 = smov 0  }
   0x4   :  { %s1163_s17 = smov 0  }
   0x5 LB: > { %s801_s18 = sadd.s32 4294967295, %s1124_s17   ;;  %s802_s19 = sadd.s32 4294967294, %s1124_s17   ;;  %s1124_s17 = sphi %s1163_s17, %s19_s17   ;;  %s1120_s16 = sphi %s1161_s16, %s1359_s16   ;;  %s1116_s15 = sphi %s1159_s15, %s1358_s15  }
   0x6   : > { %s31_s20 = sadd.s32 1, %s1120_s16  ;;  %p803_p0 = scmp.ge.s32.totalorder %s1124_s17, 1 }
   0x7   : > { %p33_p1 = scmp.ge.s32.totalorder %s31_s20, 2  ;;  %p153_p2 = scmp.lt.s32.totalorder %s1124_s17, 3 }
   0x8   : > { %p1181_p3 = scmp.eq.s32.totalorder %s801_s18, 0  ;;  %s1126_s23 = smov [#allocation6]  }
   0x9   : > { %s1361_s20 = smov (%p33_p1, %s31_s20), 0  ;;  %p1187_p4 = pnand %p803_p0, %p153_p2 }
   0xa   : > { %s1352_s21 = scalar_select %p1181_p3, 1, 0 }
   0xb   : > { %s1353_s22 = scalar_select %p1187_p4, 1, 0 }
   0xc   : > { %s169_s24 = sshll.u32 %s1126_s23, 4  ;;  %p920_p5 = pneg %p1187_p4  ;;  %s170_s24 = int_to_ptr.vmem [resolvable:$true] %s169_s24 }
   0xd   : > { %s1127_s26 = smov [#allocation9]   ;;  %s1008_s30 = scalar_lea.hbm %s1344_s0, 256 }
   0xe   : > { %p1195_p6 = pnand %p1181_p3, %p920_p5  ;;  %s182_s27 = sshll.u32 %s1127_s26, 4  ;;  %s1199_s27 = int_to_ptr.vmem [resolvable:$true] %s182_s27 }
   0xf   : > { %p1009_p7 = scmp.ne.s32.totalorder %s1344_s0, %s1008_s30  ;;  %p1015_p11 = scmp.lt.u32.totalorder %s1008_s30, %s1344_s0 }
  0x10   : > { %p1010_p8 = pneg %p1195_p6 }
  0x12   : > { %p1011_p9 = pnand %p1010_p8, %p1009_p7 }
  0x14   : > { %p1012_p10 = pneg %p1011_p9 }
  0x16   : > { %p1017_p12 = pnand %p1015_p11, %p1012_p10 }
  0x18   : > { %1020 = shalt.err (!%p1017_p12)
}
  0x19   : > { %s1021_s9 = scalar_lea.vmem %s170_s24, 256  ;;  %p1029_p2 = scmp.lt.s32.totalorder %s170_s24, %s170_s24 }
  0x1a   : > { %p1022_p13 = scmp.ne.s32.totalorder %s170_s24, %s1021_s9  ;;  %p1030_p5 = scmp.lt.s32.totalorder %s1021_s9, %s1021_s9 }
  0x1c   : > { %p1024_p0 = pnand %p1022_p13, %p1010_p8  ;;  %p1031_p3 = por %p1030_p5, %p1029_p2 }
  0x1e   : > { %p1025_p1 = pneg %p1024_p0 }
  0x20   : > { %p1032_p4 = pnand %p1031_p3, %p1025_p1 }
  0x22   : > { %1035 = shalt.err (!%p1032_p4)
}
  0x23   : > { %s1128_s10 = smov 64   ;;  %s1129_s11 = smov 4  }
  0x24   : > { %923 = dma.hbm_to_vmem [thread:$0]  (!%p1195_p6), %s1344_s0, 256, %s170_s24, [#allocation7], %s1128_s10, %s1128_s10, %s1129_s11  }
  0x25   : > { %s1036_s26 = scalar_lea.hbm %s1345_s1, 3072 }
  0x26   : > { %p1037_p7 = scmp.ne.s32.totalorder %s1345_s1, %s1036_s26  ;;  %p1043_p9 = scmp.lt.u32.totalorder %s1036_s26, %s1345_s1 }
  0x28   : > { %p1039_p3 = pnand %p1037_p7, %p1010_p8 }
  0x2a   : > { %p1040_p4 = pneg %p1039_p3 }
  0x2c   : > { %p1045_p10 = pnand %p1043_p9, %p1040_p4 }
  0x2e   : > { %1048 = shalt.err (!%p1045_p10)
}
  0x2f   : > { %s1049_s24 = scalar_lea.vmem %s1199_s27, 3072  ;;  %p1057_p0 = scmp.lt.s32.totalorder %s1199_s27, %s1199_s27 }
  0x30   : > { %p1050_p11 = scmp.ne.s32.totalorder %s1199_s27, %s1049_s24  ;;  %p1058_p1 = scmp.lt.s32.totalorder %s1049_s24, %s1049_s24 }
  0x32   : > { %p1052_p12 = pnand %p1050_p11, %p1010_p8  ;;  %p1059_p2 = por %p1058_p1, %p1057_p0 }
  0x34   : > { %p1053_p13 = pneg %p1052_p12 }
  0x36   : > { %p1060_p5 = pnand %p1059_p2, %p1053_p13 }
  0x38   : > { %1063 = shalt.err (!%p1060_p5)
}
  0x39   : > { %926 = dma.hbm_to_vmem [thread:$0]  (!%p1195_p6), %s1345_s1, 3072, %s1199_s27, [#allocation10], %s1128_s10, %s1128_s10, %s1129_s11  }
  0x3a   : > { %p1355_p7 = scmp.ne.s32.totalorder %s1353_s22, 0 }
  0x3b   : > { %p1356_p3 = scmp.ne.s32.totalorder (!%p1355_p7), %s1352_s21, 0 }
  0x3c   : > { %204 = sbr.rel (%p1355_p7) target bundleno = 449 (0x1c1), region = 36 }
  0x43   : > { %1103 = dma.done.wait (%p1356_p3), [#allocation7], 256  }
  0x44   : > { %1105 = vsyncadd (%p1356_p3), [#allocation7], 4294967040 }
  0x45   : > { %1107 = dma.done.wait (%p1356_p3), [#allocation10], 3072  }
  0x46   : > { %1109 = vsyncadd (%p1356_p3), [#allocation10], 4294964224  ;;  %v970_v0 = vld [vmem:[#allocation9 + $0x40] sm:$0xff]   ;;  %v973_v3 = vld [vmem:[#allocation9 + $0x48] sm:$0xff]   ;;  %v239_v17 = vlaneseq  ;;  %p558_p6 = scmp.eq.s32.totalorder %s1116_s15, 0 }
  0x47   : > { %v971_v1 = vld [vmem:[#allocation9] sm:$0xff]   ;;  %850 = vmatprep.subr.bf16.mxu0 %v970_v0  ;;  %v974_v4 = vld [vmem:[#allocation9 + $0x8] sm:$0xff]   ;;  %v976_v6 = vld [vmem:[#allocation9 + $0x50] sm:$0xff]  }
  0x48   : > { %v972_v2 = vld [vmem:[#allocation9 + $0x80] sm:$0xff]   ;;  %851 = vmatpush3.bf16.msra.mxu0 %v971_v1  ;;  %v975_v5 = vld [vmem:[#allocation9 + $0x88] sm:$0xff]   ;;  %v977_v7 = vld [vmem:[#allocation9 + $0x10] sm:$0xff]   ;;  %v1258_v21 = vshrl.u32 %v239_v17, 7 }
  0x49   : > { %888 = vmatprep.subr.bf16.mxu1 %v972_v2  ;;  %852 = vmatprep.subr.bf16.mxu0 %v973_v3  ;;  %v978_v8 = vld [vmem:[#allocation9 + $0x90] sm:$0xff]   ;;  %v979_v9 = vld [vmem:[#allocation9 + $0x58] sm:$0xff]   ;;  %v982_v12 = vld [vmem:[#allocation9 + $0x60] sm:$0xff]  }
  0x4a   : > { %889 = vmatpush3.bf16.msra.mxu1 %v972_v2  ;;  %v980_v10 = vld [vmem:[#allocation9 + $0x18] sm:$0xff]   ;;  %v984_v13 = vld [vmem:[#allocation9 + $0xa0] sm:$0xff]   ;;  %v985_v15 = vld [vmem:[#allocation9 + $0x68] sm:$0xff]   ;;  %vm241_vm0 = vcmp.lt.s32.totalorder %v1258_v21, 1  ;;  %vm246_vm1 = vcmp.lt.s32.totalorder %v1258_v21, 7 }
  0x4b   : > { %890 = vmatprep.subr.bf16.mxu1 %v975_v5  ;;  %v981_v11 = vld [vmem:[#allocation9 + $0x98] sm:$0xff]   ;;  %v983_v14 = vld [vmem:[#allocation9 + $0x20] sm:$0xff]   ;;  %v987_v16 = vld [vmem:[#allocation9 + $0xa8] sm:$0xff]  }
  0x4c   : > { %853 = vmatpush3.bf16.msra.mxu0 %v974_v4  ;;  %v986_v18 = vld [vmem:[#allocation9 + $0x28] sm:$0xff]   ;;  %v988_v19 = vld [vmem:[#allocation9 + $0x70] sm:$0xff]   ;;  %v991_v23 = vld [vmem:[#allocation9 + $0x78] sm:$0xff]  }
  0x4d   : > { %854 = vmatprep.subr.bf16.mxu0 %v976_v6  ;;  %v990_v20 = vld [vmem:[#allocation9 + $0xb0] sm:$0xff]   ;;  %v250_v25 = vld [vmem:[#allocation6 + $0x8] sm:$0xff]  }
  0x4e   : > { %891 = vmatpush3.bf16.msra.mxu1 %v975_v5  ;;  %v989_v22 = vld [vmem:[#allocation9 + $0x30] sm:$0xff]   ;;  %v252_v28 = vunpack.c.l.bf16 %v250_v25  ;;  %v993_v29 = vld [vmem:[#allocation9 + $0xb8] sm:$0xff]   ;;  %v253_v30 = vunpack.c.h.bf16 %v250_v25 }
  0x4f   : > { %892 = vmatprep.subr.bf16.mxu1 %v978_v8  ;;  %v233_v24 = vld [vmem:[#allocation6] sm:$0xff]   ;;  %v992_v31 = vld [vmem:[#allocation9 + $0x38] sm:$0xff]  }
  0x50   : > { %855 = vmatpush3.bf16.msra.mxu0 %v977_v7  ;;  %v235_v26 = vunpack.c.l.bf16 %v233_v24  ;;  %v236_v27 = vunpack.c.h.bf16 %v233_v24  ;;  %492 = vmatprep.mubr.bf16.mxu0 %v233_v24  ;;  %v258_v36 = vrot.slane %v252_v28, 1  ;;  %v259_v37 = vrot.slane %v253_v30, 1 }
  0x51   : > { %856 = vmatprep.subr.bf16.mxu0 %v979_v9  ;;  %v254_v46 = vrot.slane %v252_v28, 7  ;;  %v255_v47 = vrot.slane %v253_v30, 7 }
  0x52   : > { %893 = vmatpush3.bf16.msra.mxu1 %v978_v8  ;;  %v237_v32 = vrot.slane %v235_v26, 7  ;;  %v238_v33 = vrot.slane %v236_v27, 7  ;;  %v244_v34 = vrot.slane %v235_v26, 1  ;;  %v245_v35 = vrot.slane %v236_v27, 1 }
  0x53   : > { %894 = vmatprep.subr.bf16.mxu1 %v981_v11  ;;  %v260_v44 = vsel %vm246_vm1, %v258_v36, %v259_v37  ;;  %v261_v45 = vsel %vm246_vm1, %v259_v37, %v258_v36  ;;  %v256_v49 = vsel %vm241_vm0, %v254_v46, %v255_v47  ;;  %v257_v50 = vsel %vm241_vm0, %v255_v47, %v254_v46 }
  0x54   : > { %857 = vmatpush3.bf16.msra.mxu0 %v980_v10  ;;  %v242_v38 = vsel %vm241_vm0, %v237_v32, %v238_v33  ;;  %v243_v39 = vsel %vm241_vm0, %v238_v33, %v237_v32  ;;  %v247_v40 = vsel %vm246_vm1, %v244_v34, %v245_v35  ;;  %v248_v41 = vsel %vm246_vm1, %v245_v35, %v244_v34 }
  0x55   : > { %858 = vmatprep.subr.bf16.mxu0 %v982_v12  ;;  %v262_v42 = vpack.c.bf16 %v242_v38, %v243_v39  ;;  %v264_v43 = vpack.c.bf16 %v248_v41, %v247_v40  ;;  %v267_v48 = vpack.c.bf16 %v261_v45, %v260_v44  ;;  %v265_v51 = vpack.c.bf16 %v256_v49, %v257_v50 }
  0x56   : > { %895 = vmatpush3.bf16.msra.mxu1 %v981_v11  ;;  %v1130_v8 = vmov (%p558_p6), 0.0  }
  0x57   : > { %896 = vmatprep.subr.bf16.mxu1 %v984_v13  ;;  %904 = vmatprep.mubr.bf16.mxu1 %v264_v43  ;;  %564 = vst [vmem:[#allocation2] sm:$0x1] (%p558_p6), %v1130_v8  ;;  %565 = vst [vmem:[#allocation3] sm:$0x1] (%p558_p6), %v1130_v8 }
  0x58   : > { %859 = vmatpush3.bf16.msra.mxu0 %v983_v14 }
  0x59   : > { %860 = vmatprep.subr.bf16.mxu0 %v985_v15 }
  0x5a   : > { %897 = vmatpush3.bf16.msra.mxu1 %v984_v13 }
  0x5b   : > { %898 = vmatprep.subr.bf16.mxu1 %v987_v16 }
  0x5c   : > { %861 = vmatpush3.bf16.msra.mxu0 %v986_v18 }
  0x5d   : > { %862 = vmatprep.subr.bf16.mxu0 %v988_v19 }
  0x5e   : > { %899 = vmatpush3.bf16.msra.mxu1 %v987_v16 }
  0x5f   : > { %900 = vmatprep.subr.bf16.mxu1 %v990_v20 }
  0x60   : > { %863 = vmatpush3.bf16.msra.mxu0 %v989_v22 }
  0x61   : > { %864 = vmatprep.subr.bf16.mxu0 %v991_v23 }
  0x62   : > { %901 = vmatpush3.bf16.msra.mxu1 %v990_v20 }
  0x63   : > { %902 = vmatprep.subr.bf16.mxu1 %v993_v29 }
  0x64   : > { %865 = vmatpush3.bf16.msra.mxu0 %v992_v31 }
  0x66   : > { %903 = vmatpush3.bf16.msra.mxu1 %v993_v29 }
  0x67   : > { %493 = vmatmul.mubr.bf16.vlgmr.msra.gmra.mrb[0].mxu0 %v262_v42 }
  0x68   : > { %500 = vmatprep.mubr.bf16.mxu0 %v250_v25 }
  0x69   : > { %905 = vmatmul.mubr.bf16.vlgmr.msra.gmra.mrb[0].mxu1 %v267_v48 }
  0x6f   : > { %501 = vmatmul.mubr.bf16.gmra.mrb[4].mxu0 %v265_v51 }
 0x13a   : > { %v866_v52 = vpop.f32.mrb[0].mxu0 }
 0x13b   : > { %v867_v53 = vpop.f32.mrb[1].mxu0 }
 0x13c   : > { %v868_v54 = vadd.f32 %v867_v53, %v866_v52  ;;  %v869_v55 = vpop.f32.mrb[2].mxu0  ;;  %v906_v56 = vpop.f32.mrb[0].mxu1 }
 0x13d   : > { %v870_v57 = vpop.f32.mrb[3].mxu0  ;;  %v543_v58 = vpop.f32.mrb[1].mxu1 }
 0x13e   : > { %v871_v59 = vadd.f32 %v870_v57, %v869_v55  ;;  %v1279_v60 = vadd.f32 %v868_v54, %v543_v58  ;;  %v907_v61 = vpop.f32.mrb[2].mxu1 }
 0x13f   : > { %v546_v62 = vpop.f32.mrb[3].mxu1 }
 0x140   : > { %v1281_v63 = vadd.f32 %v871_v59, %v546_v62  ;;  %566 = vst [vmem:[#allocation4] sm:$0x1] (%p558_p6), %v1279_v60 }
 0x142   : > { %v872_v0 = vpop.f32.mrb[4].mxu0  ;;  %563 = sbr.rel (!%p558_p6) target bundleno = 329 (0x149), region = 48 }
 0x143   : > { %v873_v1 = vpop.f32.mrb[5].mxu0 }
 0x144   : > { %v874_v2 = vadd.f32 %v873_v1, %v872_v0  ;;  %v875_v3 = vpop.f32.mrb[6].mxu0 }
 0x145   : > { %v876_v4 = vpop.f32.mrb[7].mxu0 }
 0x146   : > { %v1283_v5 = vadd.f32 %v906_v56, %v874_v2  ;;  %v877_v6 = vadd.f32 %v876_v4, %v875_v3 }
 0x148   : > { %v1285_v7 = vadd.f32 %v907_v61, %v877_v6 }
 0x149 PF: > { %p836_p8 = scmp.ne.s32.totalorder %s1116_s15, 0 }
 0x14a   : > { %v837_v9 = vld [vmem:[#allocation4] ss:$0 sm:$0xff] (!%p836_p8)  ;;  %v581_v34 = vld [vmem:[#allocation2] sm:$0x1] (!%p836_p8)  ;;  %v593_v37 = vld [vmem:[#allocation3] sm:$0x1] (!%p836_p8) }
 0x14b   : > { %569 = sbr.rel (%p836_p8) target bundleno = 356 (0x164), region = 52  ;;  %v577_v10 = vsub.f32 (!%p836_p8), %v1279_v60, %v837_v9  ;;  %v578_v11 = vsub.f32 (!%p836_p8), %v1281_v63, %v837_v9  ;;  %v579_v12 = vsub.f32 (!%p836_p8), %v1283_v5, %v837_v9  ;;  %v580_v13 = vsub.f32 (!%p836_p8), %v1285_v7, %v837_v9 }
 0x14d   : > { %v582_v14 = vadd.f32 (!%p836_p8), %v578_v11, %v577_v10  ;;  %v594_v15 = vmul.f32 (!%p836_p8), %v577_v10, %v577_v10  ;;  %v595_v16 = vmul.f32 (!%p836_p8), %v578_v11, %v578_v11  ;;  %v596_v17 = vmul.f32 (!%p836_p8), %v579_v12, %v579_v12 }
 0x14e   : > { %v597_v19 = vmul.f32 (!%p836_p8), %v580_v13, %v580_v13 }
 0x14f   : > { %v583_v18 = vadd.f32 (!%p836_p8), %v582_v14, %v579_v12  ;;  %v598_v20 = vadd.f32 (!%p836_p8), %v595_v16, %v594_v15 }
 0x151   : > { %v584_v22 = vadd.f32 (!%p836_p8), %v583_v18, %v580_v13  ;;  %v599_v23 = vadd.f32 (!%p836_p8), %v598_v20, %v596_v17 }
 0x153   : > { %v585_v24 = vrot.slane %v584_v22, 4  ;;  %v600_v25 = vadd.f32 %v599_v23, %v597_v19 }
 0x155   : > { %v586_v26 = vadd.f32 %v585_v24, %v584_v22  ;;  %v601_v27 = vrot.slane %v600_v25, 4 }
 0x157   : > { %v587_v28 = vrot.slane %v586_v26, 2  ;;  %v602_v29 = vadd.f32 %v601_v27, %v600_v25 }
 0x159   : > { %v588_v30 = vadd.f32 %v587_v28, %v586_v26  ;;  %v603_v31 = vrot.slane %v602_v29, 2 }
 0x15b   : > { %v589_v32 = vrot.slane %v588_v30, 1  ;;  %v604_v33 = vadd.f32 %v603_v31, %v602_v29 }
 0x15d   : > { %v590_v35 = vadd.f32 %v589_v32, %v588_v30  ;;  %v605_v36 = vrot.slane %v604_v33, 1 }
 0x15f   : > { %v591_v38 = vadd.f32 %v590_v35, %v581_v34  ;;  %v606_v39 = vadd.f32 %v605_v36, %v604_v33 }
 0x161   : > { %592 = vst [vmem:[#allocation2] sm:$0x1] %v591_v38  ;;  %v607_v40 = vadd.f32 %v606_v39, %v593_v37 }
 0x163   : > { %608 = vst [vmem:[#allocation3] sm:$0x1] %v607_v40 }
 0x164 PF: > { %p838_p4 = scmp.ne.s32.totalorder %s1116_s15, 1 }
 0x165   : > { %v615_v49 = vld [vmem:[#allocation4] sm:$0x1] (!%p838_p4)  ;;  %v629_v51 = vsub.s32 (!%p838_p4), 0, %v1258_v21  ;;  %v624_v53 = vld [vmem:[%s1346_s2] sm:$0x1] (!%p838_p4)  ;;  %vm685_vm6 = vcmp.eq.s32.totalorder (!%p838_p4), %v1258_v21, 0 }
 0x166   : > { %612 = sbr.rel (%p838_p4) target bundleno = 425 (0x1a9), region = 56  ;;  %v839_v62 = vld [vmem:[%s1347_s3] ss:$0 sm:$0xff] (!%p838_p4) }
 0x168   : > { %v613_v41 = vld [vmem:[#allocation2] sm:$0x1] (!%p838_p4) }
 0x169   : > { %v614_v43 = vmul.f32 (!%p838_p4), 0.03125, %v613_v41 }
 0x16a   : > { %v617_v42 = vld [vmem:[#allocation3] sm:$0x1] (!%p838_p4) }
 0x16b   : > { %v618_v44 = vmul.f32 (!%p838_p4), 0.03125, %v617_v42  ;;  %v619_v45 = vmul.f32 (!%p838_p4), %v614_v43, %v614_v43  ;;  %v616_v50 = vadd.f32 (!%p838_p4), %v615_v49, %v614_v43 }
 0x16d   : > { %v620_v46 = vsub.f32 %v618_v44, %v619_v45  ;;  %v630_v52 = vrot.slane %v616_v50, %v629_v51 }
 0x16f   : > { %v621_v47 = vmax.f32 %v620_v46, 0.0  ;;  %v632_v55 = vsub.f32 %v1279_v60, %v630_v52  ;;  %v633_v57 = vsub.f32 %v1281_v63, %v630_v52  ;;  %v634_v58 = vsub.f32 %v1283_v5, %v630_v52 }
 0x170   : > { %v635_v59 = vsub.f32 %v1285_v7, %v630_v52 }
 0x171   : > { %v622_v48 = vadd.f32 1e-05, %v621_v47 }
 0x173   : > { %998 = vrsqrt.f32 %v622_v48 }
 0x17d   : > { %v999_v54 = vpop.eup %998 }
 0x17e   : > { %v625_v56 = vmul.f32 %v999_v54, %v624_v53 }
 0x180   : > { %v640_v61 = vrot.slane %v625_v56, %v629_v51 }
 0x182   : > { %v642_v0 = vmul.f32 %v640_v61, %v632_v55  ;;  %v643_v1 = vmul.f32 %v640_v61, %v633_v57  ;;  %v644_v2 = vmul.f32 %v640_v61, %v634_v58  ;;  %v645_v3 = vmul.f32 %v640_v61, %v635_v59 }
 0x184   : > { %v653_v4 = vadd.f32 %v839_v62, %v642_v0  ;;  %v654_v6 = vadd.f32 %v839_v62, %v643_v1  ;;  %v655_v8 = vadd.f32 %v839_v62, %v644_v2  ;;  %v656_v60 = vadd.f32 %v839_v62, %v645_v3 }
 0x186   : > { %v661_v9 = vmin.f32 %v653_v4, 0.0  ;;  %v662_v10 = vmin.f32 %v654_v6, 0.0  ;;  %v663_v63 = vmin.f32 %v655_v8, 0.0  ;;  %v664_v11 = vmin.f32 %v656_v60, 0.0 }
 0x187   : > { %vm657_vm2 = vcmp.gt.f32.partialorder %v653_v4, 0.0  ;;  %vm658_vm3 = vcmp.gt.f32.partialorder %v654_v6, 0.0  ;;  %vm659_vm4 = vcmp.gt.f32.partialorder %v655_v8, 0.0  ;;  %vm660_vm5 = vcmp.gt.f32.partialorder %v656_v60, 0.0 }
 0x188   : > { %v665_v5 = vmul.f32 1.442695, %v661_v9  ;;  %v667_v12 = vmul.f32 1.442695, %v662_v10  ;;  %v669_v7 = vmul.f32 1.442695, %v663_v63 }
 0x189   : > { %v671_v13 = vmul.f32 1.442695, %v664_v11 }
 0x18a   : > { %1000 = vpow2.f32 %v665_v5 }
 0x18b   : > { %1002 = vpow2.f32 %v667_v12 }
 0x18c   : > { %1004 = vpow2.f32 %v669_v7 }
 0x18d   : > { %1006 = vpow2.f32 %v671_v13 }
 0x194   : > { %v1001_v14 = vpop.eup %1000 }
 0x195   : > { %v1003_v15 = vpop.eup %1002  ;;  %v840_v16 = vadd.f32 -1.0, %v1001_v14 }
 0x196   : > { %v1005_v17 = vpop.eup %1004  ;;  %v841_v18 = vadd.f32 -1.0, %v1003_v15 }
 0x197   : > { %v1007_v19 = vpop.eup %1006  ;;  %v677_v20 = vsel %vm657_vm2, %v653_v4, %v840_v16  ;;  %v842_v22 = vadd.f32 -1.0, %v1005_v17 }
 0x198   : > { %681 = vst [vmem:[#allocation5] sm:$0xff] %v677_v20  ;;  %v678_v23 = vsel %vm658_vm3, %v654_v6, %v841_v18  ;;  %v843_v24 = vadd.f32 -1.0, %v1007_v19 }
 0x199   : > { %682 = vst [vmem:[#allocation5 + $0x8] sm:$0xff] %v678_v23  ;;  %v679_v25 = vsel %vm659_vm4, %v655_v8, %v842_v22 }
 0x19a   : > { %683 = vst [vmem:[#allocation5 + $0x10] sm:$0xff] %v679_v25  ;;  %v680_v26 = vsel %vm660_vm5, %v656_v60, %v843_v24 }
 0x19b   : > { %684 = vst [vmem:[#allocation5 + $0x18] sm:$0xff] %v680_v26 }
 0x1a0   : > { %v686_v27 = vld [vmem:[#allocation5] ss:$2 sm:$0xff]  ;;  %v688_v28 = vld [vmem:[#allocation5 + $0x1] ss:$2 sm:$0xff] }
 0x1a1   : > { %v689_v29 = vrot.slane %v688_v28, 7  ;;  %v691_v30 = vmax.f32 %v686_v27, %v688_v28 }
 0x1a2   : > { %v695_v31 = vld [vmem:[#allocation5 + $0x10] ss:$2 sm:$0xff]  ;;  %v697_v32 = vld [vmem:[#allocation5 + $0x11] ss:$2 sm:$0xff] }
 0x1a3   : > { %v690_v33 = vsel %vm685_vm6, -1e+30, %v689_v29  ;;  %v698_v34 = vrot.slane %v697_v32, 7  ;;  %v700_v35 = vmax.f32 %v695_v31, %v697_v32 }
 0x1a4   : > { %v692_v36 = vmax.f32 %v691_v30, %v690_v33 }
 0x1a5   : > { %v699_v37 = vsel %vm685_vm6, -1e+30, %v698_v34 }
 0x1a6   : > { %693 = vst [vmem:[#allocation11] sm:$0xff] %v692_v36  ;;  %v701_v38 = vmax.f32 %v700_v35, %v699_v37 }
 0x1a8   : > { %844 = vst [vmem:[#allocation11 + $0x8] sm:$0xff] %v701_v38 }
 0x1a9 PF: > { %p1310_p9 = scmp.eq.s32.totalorder %s801_s18, 1  ;;  %s1131_s8 = smov [#allocation11]  }
 0x1aa   : > { %s719_s9 = sshll.u32 %s1131_s8, 4  ;;  %s720_s9 = int_to_ptr.vmem [resolvable:$true] %s719_s9 }
 0x1ab   : > { %s1064_s10 = scalar_lea.vmem %s720_s9, 256  ;;  %s1070_s11 = scalar_lea.vmem %s720_s9, 512 }
 0x1ac   : > { %p1065_p10 = scmp.ne.s32.totalorder %s720_s9, %s1064_s10  ;;  %p1071_p13 = scmp.lt.s32.totalorder %s720_s9, %s720_s9 }
 0x1ad   : > { %p1072_p0 = scmp.lt.s32.totalorder %s1070_s11, %s1064_s10 }
 0x1ae   : > { %p1066_p11 = pnand %p1065_p10, %p1310_p9 }
 0x1af   : > { %p1073_p1 = por %p1072_p0, %p1071_p13 }
 0x1b0   : > { %p1067_p12 = pneg %p1066_p11 }
 0x1b2   : > { %p1074_p2 = pnand %p1073_p1, %p1067_p12 }
 0x1b4   : > { %1077 = shalt.err (!%p1074_p2)
}
 0x1b5   : > { %s1078_s13 = scalar_lea.hbm %s1348_s4, 256 }
 0x1b6   : > { %p1079_p5 = scmp.ne.s32.totalorder %s1348_s4, %s1078_s13  ;;  %p1084_p6 = scmp.lt.u32.totalorder %s1078_s13, %s1348_s4 }
 0x1b8   : > { %p1080_p7 = pnand %p1079_p5, %p1310_p9 }
 0x1ba   : > { %p1081_p3 = pneg %p1080_p7 }
 0x1bc   : > { %p1086_p8 = pnand %p1084_p6, %p1081_p3 }
 0x1be   : > { %1089 = shalt.err (!%p1086_p8)
}
 0x1bf   : > { %s1132_s29 = smov 128   ;;  %s1133_s30 = smov 8  }
 0x1c0   : > { %917 = dma.vmem_to_hbm [thread:$0]  (%p1310_p9), %s720_s9, 256, %s1348_s4, [#allocation8], %s1132_s29, %s1132_s29, %s1133_s30  }
 0x1c1 PF: > { %p936_p4 = scmp.ge.s32.totalorder %s1124_s17, 2  ;;  %p937_p10 = scmp.eq.s32.totalorder %s802_s19, 1 }
 0x1c3   : > { %p928_p11 = pnand %p937_p10, %p936_p4 }
 0x1c5   : > { %1111 = dma.done.wait (!%p928_p11), [#allocation8], 256  }
 0x1c6   : > { %1113 = vsyncadd (!%p928_p11), [#allocation8], 4294967040  ;;  %s19_s17 = sadd.s32 1, %s1124_s17   ;;  %s1358_s15 = smov %s1120_s16 }
 0x1c7   : > { %p16_p12 = scmp.ge.s32.totalorder %s19_s17, 4   ;;  %s1359_s16 = smov %s1361_s20 }
 0x1c9   :  { %18 = sbr.rel (!%p16_p12) target bundleno = 5 (0x5), region = 95 }
 0x1d0   :  { %740 = vsyncpa [#allocation7], 1 }
 0x1d1   :  { %742 = vsyncpa [#allocation7 + $0x1], 1 }
 0x1d2   :  { %743 = vsyncpa [#allocation10], 1 }
 0x1d3   :  { %744 = vsyncpa [#allocation8], 1 }
 0x1d4   :  { %746 = vsyncpa [#allocation8 + $0x1], 1 }

</bundles_post_ra>
